<compile_context>
chip_gen: v7x
topology: tpu7x:2x2x1
jax: 0.10.0
libtpu: 0.0.40
codegen_flags: <defaults>
</compile_context>

<pallas_src>
import functools

import jax
import jax.numpy as jnp
from jax.experimental import pallas as pl
from jax.experimental.pallas import tpu as pltpu


def _pointwise_conv_kernel(w_ref, b_ref, x_ref, o_ref, *, use_mxu):
    """One (batch, HW-tile) block: out = W @ x + b over the channel dim."""
    x = x_ref[0]                                 # (Cin, T)  lanes = spatial, native dtype
    w = w_ref[...]                               # (Cout, Cin)
    b = b_ref[...].astype(jnp.float32)           # (Cout, 1) broadcasts over lanes

    if use_mxu:
        # MXU takes bf16/f32 natively with f32 accumulation -> no x upcast.
        acc = jnp.dot(w, x, preferred_element_type=jnp.float32) + b   # (Cout, T)
    else:
        # Tiny contraction (Cin < 8): MXU would be <1% utilized; do a bounded
        # VPU broadcast-accumulate instead (f32 so it also works on v5e's VPU).
        xf = x.astype(jnp.float32)
        wf = w.astype(jnp.float32)
        cout, cin = wf.shape
        t = xf.shape[1]
        acc = jnp.broadcast_to(b, (cout, t))     # hoisted once
        for ci in range(cin):                    # static unroll, cin < 8 only
            acc = acc + wf[:, ci:ci + 1] * xf[ci:ci + 1, :]

    o_ref[0] = acc.astype(o_ref.dtype)


def _vmem_budget_bytes():
    """Per-generation VMEM budget for kernel-visible buffers."""
    cap = 64 * 1024 * 1024                       # conservative fallback (v7x per-TC)
    try:
        cap = int(pltpu.get_tpu_info().vmem_capacity_bytes)
    except Exception:
        pass
    # ~0.7 * physical: ~90 MiB on v5e/v6e (128 MiB), ~45 MiB on v7x (64 MiB).
    return int(0.7 * cap), cap


def _choose_hw_tile(hw, cin, cout, itemsize, budget):
    """Largest legal HW tile whose kernel-visible footprint fits `budget`.

    Footprint per lane element of the tile:
      * double-buffered input block:   2 * cin  * itemsize
      * double-buffered output block:  2 * cout * itemsize
      * in-kernel f32 accumulator (+ upcast headroom): (cin + cout) * 4
    """
    per_elem = 2 * (cin + cout) * itemsize + (cin + cout) * 4

    if hw % 128 != 0:
        # Last-dim blocks must be a multiple of 128 or the full extent; fall
        # back to the full extent (legal) and rely on the raised VMEM limit.
        # TODO(synk): add a padding path for large HW that is not a 128 multiple.
        return hw

    best = None
    t = 128
    while t <= hw:                               # all multiples of 128 dividing HW
        if hw % t == 0 and per_elem * t <= budget:
            best = t
        t += 128
    if best is None:
        best = 128                               # smallest legal tile; never over-pick
    return best


def outconv_forward(x, weight, bias):
    """
    x:      (N, Cin, H, W)      float32 / bfloat16
    weight: (Cout, Cin, 1, 1)   (PyTorch OIHW layout)
    bias:   (Cout,)
    returns (N, Cout, H, W) matching nn.Conv2d(Cin, Cout, 1)(x).
    """
    N, Cin, H, W = x.shape
    Cout = weight.shape[0]
    HW = H * W

    # Free reshapes (contiguous): spatial dims fold into the lane dimension.
    x2 = x.reshape(N, Cin, HW)
    w2 = weight.reshape(Cout, Cin)
    b2 = bias.reshape(Cout, 1)

    budget, vmem_cap = _vmem_budget_bytes()
    T = _choose_hw_tile(HW, Cin, Cout, x.dtype.itemsize, budget)

    # v7x shards "parallel" grid axes across its 2 TensorCores; make sure there
    # are at least 2 grid steps when the whole problem would otherwise be one
    # (halving keeps T a multiple of 128 and still dividing HW).
    while N * (HW // T) < 2 and T % 256 == 0:
        T //= 2
    n_hw = HW // T

    # MXU gate on contraction depth only: large-Cin / tiny-Cout heads use the MXU.
    use_mxu = Cin >= 8

    kernel = functools.partial(_pointwise_conv_kernel, use_mxu=use_mxu)

    vmem_limit = min(vmem_cap, budget + (4 << 20))

    out = pl.pallas_call(
        kernel,
        out_shape=jax.ShapeDtypeStruct((N, Cout, HW), x.dtype),
        grid_spec=pltpu.PrefetchScalarGridSpec(
            num_scalar_prefetch=0,
            grid=(N, n_hw),
            in_specs=[
                # All filters at once; constant block index -> fetched once, kept in VMEM.
                pl.BlockSpec((Cout, Cin), lambda n, t: (0, 0)),
                pl.BlockSpec((Cout, 1), lambda n, t: (0, 0)),
                # One (all-channels, HW-tile) slab per grid step.
                pl.BlockSpec((1, Cin, T), lambda n, t: (n, 0, t)),
            ],
            out_specs=pl.BlockSpec((1, Cout, T), lambda n, t: (n, 0, t)),
        ),
        compiler_params=pltpu.CompilerParams(
            dimension_semantics=("parallel", "parallel"),
            vmem_limit_bytes=int(vmem_limit)),
    )(w2, b2, x2)

    return out.reshape(N, Cout, H, W)


def _reference(x, weight, bias):
    """Pure-JAX reference (lax 1x1 conv) for verification."""
    out = jax.lax.conv_general_dilated(
        x, weight,
        window_strides=(1, 1),
        padding="VALID",
        dimension_numbers=("NCHW", "OIHW", "NCHW"),
    )
    return out + bias[None, :, None, None]


if __name__ == "__main__":
    # Module config: outconv(in_ch=4, out_ch=4), small spatial size.
    N, in_ch, out_ch, H, W = 2, 4, 4, 16, 16

    key = jax.random.PRNGKey(0)
    kx, kw, kb = jax.random.split(key, 3)
    x = jax.random.normal(kx, (N, in_ch, H, W), dtype=jnp.float32)
    weight = 0.1 * jax.random.normal(kw, (out_ch, in_ch, 1, 1), dtype=jnp.float32)
    bias = 0.1 * jax.random.normal(kb, (out_ch,), dtype=jnp.float32)

    out = outconv_forward(x, weight, bias)
    out = jax.block_until_ready(out)

    ref = _reference(x, weight, bias)
    assert out.shape == ref.shape, (out.shape, ref.shape)
    assert jnp.allclose(out, ref, atol=1e-5, rtol=1e-5), "mismatch vs lax reference"

    # Extra check: a larger-Cin / tiny-Cout head (exercises the MXU path).
    in2, out2 = 32, 2
    x_b = jax.random.normal(kx, (1, in2, H, W), dtype=jnp.float32)
    w_b = 0.1 * jax.random.normal(kw, (out2, in2, 1, 1), dtype=jnp.float32)
    b_b = 0.1 * jax.random.normal(kb, (out2,), dtype=jnp.float32)
    out_b = jax.block_until_ready(outconv_forward(x_b, w_b, b_b))
    ref_b = _reference(x_b, w_b, b_b)
    assert jnp.allclose(out_b, ref_b, atol=1e-5, rtol=1e-5), "MXU path mismatch"

    print("KERNEL_OK")
</pallas_src>

<mosaic_0001>
module attributes {stable_mosaic.version = 11 : i64} {
  func.func @_pointwise_conv_kernel(%arg0: i32, %arg1: i32, %arg2: memref<4x4xf32, #tpu.memory_space<vmem>>, %arg3: memref<4x1xf32, #tpu.memory_space<vmem>>, %arg4: memref<1x4x256xf32, #tpu.memory_space<vmem>>, %arg5: memref<1x4x256xf32, #tpu.memory_space<vmem>>) attributes {dimension_semantics = [#tpu.dimension_semantics<parallel>, #tpu.dimension_semantics<parallel>], iteration_bounds = array<i64: 2, 1>, scalar_prefetch = 0 : i64, scratch_operands = 0 : i64, tpu.core_type = #tpu.core_type<tc>, window_params = [{pipeline_mode = #tpu.pipeline_mode<synchronous>, transform_indices = @transform_0, window_bounds = array<i64: 4, 4>}, {pipeline_mode = #tpu.pipeline_mode<synchronous>, transform_indices = @transform_1, window_bounds = array<i64: 4, 1>}, {transform_indices = @transform_2, window_bounds = array<i64: 1, 4, 256>}, {transform_indices = @transform_3, window_bounds = array<i64: 1, 4, 256>}]} {
    %c0 = arith.constant 0 : index
    %c0_0 = arith.constant 0 : index
    %c0_1 = arith.constant 0 : index
    %0 = vector.load %arg4[%c0, %c0_0, %c0_1] : memref<1x4x256xf32, #tpu.memory_space<vmem>>, vector<1x4x256xf32>
    %1 = vector.shape_cast %0 : vector<1x4x256xf32> to vector<4x256xf32>
    %c0_2 = arith.constant 0 : index
    %c0_3 = arith.constant 0 : index
    %2 = vector.load %arg2[%c0_2, %c0_3] : memref<4x4xf32, #tpu.memory_space<vmem>>, vector<4x4xf32>
    %c0_4 = arith.constant 0 : index
    %c0_5 = arith.constant 0 : index
    %3 = vector.load %arg3[%c0_4, %c0_5] : memref<4x1xf32, #tpu.memory_space<vmem>>, vector<4x1xf32>
    %4 = vector.shape_cast %3 : vector<4x1xf32> to vector<4x1xf32>
    %5 = vector.broadcast %4 : vector<4x1xf32> to vector<4x256xf32>
    %6 = vector.extract_strided_slice %2 {offsets = [0, 0], sizes = [4, 1], strides = [1, 1]} : vector<4x4xf32> to vector<4x1xf32>
    %7 = vector.extract_strided_slice %1 {offsets = [0, 0], sizes = [1, 256], strides = [1, 1]} : vector<4x256xf32> to vector<1x256xf32>
    %8 = vector.broadcast %6 : vector<4x1xf32> to vector<4x256xf32>
    %9 = vector.broadcast %7 : vector<1x256xf32> to vector<4x256xf32>
    %10 = arith.mulf %8, %9 : vector<4x256xf32>
    %11 = arith.addf %5, %10 : vector<4x256xf32>
    %12 = vector.extract_strided_slice %2 {offsets = [0, 1], sizes = [4, 1], strides = [1, 1]} : vector<4x4xf32> to vector<4x1xf32>
    %13 = vector.extract_strided_slice %1 {offsets = [1, 0], sizes = [1, 256], strides = [1, 1]} : vector<4x256xf32> to vector<1x256xf32>
    %14 = vector.broadcast %12 : vector<4x1xf32> to vector<4x256xf32>
    %15 = vector.broadcast %13 : vector<1x256xf32> to vector<4x256xf32>
    %16 = arith.mulf %14, %15 : vector<4x256xf32>
    %17 = arith.addf %11, %16 : vector<4x256xf32>
    %18 = vector.extract_strided_slice %2 {offsets = [0, 2], sizes = [4, 1], strides = [1, 1]} : vector<4x4xf32> to vector<4x1xf32>
    %19 = vector.extract_strided_slice %1 {offsets = [2, 0], sizes = [1, 256], strides = [1, 1]} : vector<4x256xf32> to vector<1x256xf32>
    %20 = vector.broadcast %18 : vector<4x1xf32> to vector<4x256xf32>
    %21 = vector.broadcast %19 : vector<1x256xf32> to vector<4x256xf32>
    %22 = arith.mulf %20, %21 : vector<4x256xf32>
    %23 = arith.addf %17, %22 : vector<4x256xf32>
    %24 = vector.extract_strided_slice %2 {offsets = [0, 3], sizes = [4, 1], strides = [1, 1]} : vector<4x4xf32> to vector<4x1xf32>
    %25 = vector.extract_strided_slice %1 {offsets = [3, 0], sizes = [1, 256], strides = [1, 1]} : vector<4x256xf32> to vector<1x256xf32>
    %26 = vector.broadcast %24 : vector<4x1xf32> to vector<4x256xf32>
    %27 = vector.broadcast %25 : vector<1x256xf32> to vector<4x256xf32>
    %28 = arith.mulf %26, %27 : vector<4x256xf32>
    %29 = arith.addf %23, %28 : vector<4x256xf32>
    %c0_6 = arith.constant 0 : index
    %c0_7 = arith.constant 0 : index
    %c0_8 = arith.constant 0 : index
    %30 = vector.load %arg5[%c0_6, %c0_7, %c0_8] : memref<1x4x256xf32, #tpu.memory_space<vmem>>, vector<1x4x256xf32>
    %31 = vector.shape_cast %30 : vector<1x4x256xf32> to vector<4x256xf32>
    %32 = vector.shape_cast %29 : vector<4x256xf32> to vector<1x4x256xf32>
    tpu.vector_store %arg5[%c0_6, %c0_7, %c0_8], %32 {strides = array<i32>} : memref<1x4x256xf32, #tpu.memory_space<vmem>>, vector<1x4x256xf32>,
    return
  }
  func.func @transform_0(%arg0: i32, %arg1: i32) -> (i32, i32) {
    %c0_i32 = arith.constant 0 : i32
    %c0_i32_0 = arith.constant 0 : i32
    %c0_i32_1 = arith.constant 0 : i32
    return %c0_i32, %c0_i32_0 : i32, i32
  }
  func.func @transform_1(%arg0: i32, %arg1: i32) -> (i32, i32) {
    %c0_i32 = arith.constant 0 : i32
    %c0_i32_0 = arith.constant 0 : i32
    %c0_i32_1 = arith.constant 0 : i32
    return %c0_i32, %c0_i32_0 : i32, i32
  }
  func.func @transform_2(%arg0: i32, %arg1: i32) -> (i32, i32, i32) {
    %c0_i32 = arith.constant 0 : i32
    %c0_i32_0 = arith.constant 0 : i32
    return %arg0, %c0_i32, %arg1 : i32, i32, i32
  }
  func.func @transform_3(%arg0: i32, %arg1: i32) -> (i32, i32, i32) {
    %c0_i32 = arith.constant 0 : i32
    %c0_i32_0 = arith.constant 0 : i32
    return %arg0, %c0_i32, %arg1 : i32, i32, i32
  }
}

</mosaic_0001>

<bundles_post_ra>
// kernel: tpu_custom_call.1
= control target key start
LH: loop header
LB: loop body
LE: loop exit
PB: predicated region body
PF: predicated region fallthrough
CT: control target
= control target key end

     0   :  { %8 = vsyncpa [#allocation3], 0  ;;  %s836_s0 = inlined_call_operand.vmem [shape: f32[4,4], index: 0, kind: input, shape index: {}]   ;;  %s837_s1 = inlined_call_operand.vmem [shape: f32[4,1], index: 1, kind: input, shape index: {}]   ;;  %s838_s2 = inlined_call_operand.hbm [shape: f32[2,4,256], index: 2, kind: input, shape index: {}]   ;;  %s839_s3 = inlined_call_operand.hbm [shape: f32[2,4,256], index: 3, kind: output, shape index: {}]  }
   0x1   :  { %10 = vsyncpa [#allocation3 + $0x1], 0 }
   0x2   :  { %11 = vsyncpa [#allocation4], 0 }
   0x3   :  { %13 = vsyncpa [#allocation4 + $0x1], 0  ;;  %s654_s12 = smov 0   ;;  %s656_s13 = smov 0  }
   0x4   :  { %s658_s14 = smov 0   ;;  %s660_s15 = smov 0  }
   0x5   :  { %s662_s16 = smov 0   ;;  %s664_s17 = smov 0  }
   0x6 LB: > { %s427_s18 = sadd.s32 4294967295, %s626_s17   ;;  %s428_s19 = sadd.s32 4294967294, %s626_s17   ;;  %s626_s17 = sphi %s664_s17, %s19_s17   ;;  %s622_s16 = sphi %s662_s16, %s855_s16   ;;  %s618_s15 = sphi %s660_s15, %s854_s15   ;;  %s614_s14 = sphi %s658_s14, %s853_s14   ;;  %s610_s13 = sphi %s656_s13, %s852_s13   ;;  %s606_s12 = sphi %s654_s12, %s851_s12  }
   0x7   : > { %s31_s20 = sadd.s32 1, %s622_s16  ;;  %s82_s21 = sadd.s32 1, %s614_s14 }
   0x8   : > { %p33_p0 = scmp.ge.s32.totalorder %s31_s20, 2  ;;  %p89_p1 = scmp.ne.s32.totalorder %s614_s14, %s610_s13 }
   0x9   : > { %p90_p2 = scmp.eq.s32.totalorder %s626_s17, 0  ;;  %p95_p3 = scmp.ne.s32.totalorder %s610_s13, %s606_s12 }
   0xa   : > { %s857_s20 = smov (%p33_p0, %s31_s20), 0  ;;  %p96_p5 = scmp.eq.s32.totalorder %s427_s18, 0 }
   0xb   : > { %p695_p4 = por %p90_p2, %p89_p1  ;;  %s77_s23 = ssub.s32 %s622_s16, %s857_s20 }
   0xc   : > { %p121_p6 = scmp.eq.s32.totalorder %s427_s18, 1  ;;  %p80_p7 = scmp.eq.s32.totalorder %s77_s23, 0 }
   0xd   : > { %p701_p8 = por %p96_p5, %p95_p3  ;;  %p127_p10 = scmp.eq.s32.totalorder %s428_s19, 1 }
   0xe   : > { %p705_p9 = por %p121_p6, %p89_p1  ;;  %p456_p13 = scmp.lt.s32.totalorder %s626_s17, 2 }
   0xf   : > { %s710_s26 = scalar_select %p80_p7, %s614_s14, %s82_s21  }
  0x10   : > { %s843_s25 = scalar_select %p705_p9, 1, 0 }
  0x11   : > { %p712_p11 = por %p127_p10, %p95_p3  ;;  %s153_s28 = sand.u32 1, %s614_s14  }
  0x12   : > { %s431_s29 = sshll.u32 %s153_s28, 3  ;;  %s442_s30 = sshll.u32 %s622_s16, 7 }
  0x13   : > { %s844_s27 = scalar_select %p712_p11, 1, 0 }
  0x14   : > { %s723_s6 = scalar_lea.hbm %s838_s2, %s442_s30  ;;  %s157_s7 = scalar_lea.vmem [#allocation2], %s431_s29 }
  0x15   : > { %s167_s8 = sshll.u32 %s157_s7, 4  ;;  %p729_p0 = pnand %p456_p13, %p695_p4  ;;  %s725_s8 = int_to_ptr.vmem [resolvable:$true] %s167_s8 }
  0x16   : > { %s154_s10 = scalar_lea.sflag [#allocation3], %s153_s28  ;;  %s514_s11 = scalar_lea.hbm %s723_s6, 128 }
  0x17   : > { %p515_p3 = scmp.ne.s32.totalorder %s723_s6, %s514_s11  ;;  %p516_p5 = pneg %p729_p0 }
  0x18   : > { %s519_s21 = scalar_lea.hbm %s838_s2, 256  ;;  %p520_p4 = scmp.lt.u32.totalorder %s723_s6, %s838_s2 }
  0x19   : > { %p517_p6 = pnand %p516_p5, %p515_p3  ;;  %p521_p10 = scmp.lt.u32.totalorder %s519_s21, %s514_s11 }
  0x1a   : > { %p523_p12 = scmp.lt.u32.totalorder %s514_s11, %s723_s6 }
  0x1b   : > { %p518_p7 = pneg %p517_p6  ;;  %p522_p13 = por %p521_p10, %p520_p4 }
  0x1d   : > { %p524_p1 = por %p523_p12, %p522_p13 }
  0x1f   : > { %p525_p2 = pnand %p524_p1, %p518_p7 }
  0x21   : > { %528 = shalt.err (!%p525_p2)
}
  0x22   : > { %s529_s28 = scalar_lea.vmem %s725_s8, 128  ;;  %s628_s29 = smov [#allocation2]  }
  0x23   : > { %p530_p3 = scmp.ne.s32.totalorder %s725_s8, %s529_s28  ;;  %s534_s30 = sshll.u32 %s628_s29, 4  ;;  %s535_s30 = int_to_ptr.vmem [resolvable:$false] %s534_s30 }
  0x24   : > { %s536_s4 = scalar_lea.vmem %s535_s30, 256  ;;  %p537_p9 = scmp.lt.s32.totalorder %s725_s8, %s535_s30 }
  0x25   : > { %p532_p6 = pnand %p530_p3, %p516_p5  ;;  %p538_p4 = scmp.lt.s32.totalorder %s536_s4, %s529_s28 }
  0x27   : > { %p533_p11 = pneg %p532_p6  ;;  %p539_p10 = por %p538_p4, %p537_p9 }
  0x29   : > { %p540_p12 = pnand %p539_p10, %p533_p11 }
  0x2b   : > { %543 = shalt.err (!%p540_p12)
}
  0x2c   : > { %451 = dma.hbm_to_vmem [thread:$0]  (!%p729_p0), %s723_s6, 128, %s725_s8, %s154_s10  }
  0x2d   : > { %p846_p1 = scmp.lt.s32.totalorder %s626_s17, 3  ;;  %p847_p2 = scmp.ge.s32.totalorder %s626_s17, 1 }
  0x2f   : > { %p173_p5 = pnand %p847_p2, %p846_p1 }
  0x30   : > { %s765_s5 = sand.u32 (!%p173_p5), 1, %s610_s13  }
  0x31   : > { %176 = sbr.rel (%p173_p5) target bundleno = 216 (0xd8), region = 32  ;;  %s435_s7 = sshll.u32 (!%p173_p5), %s765_s5, 3 }
  0x32   : > { %s179_s11 = scalar_lea.sflag (!%p173_p5), [#allocation3], %s765_s5  ;;  %s182_s9 = scalar_lea.vmem (!%p173_p5), [#allocation2], %s435_s7 }
  0x38   : > { %597 = dma.done.wait (%p701_p8), %s179_s11, 128  }
  0x39   : > { %599 = vsyncadd (%p701_p8), %s179_s11, 4294967168  ;;  %v629_v0 = vmov 0   ;;  %v630_v1 = vmov 1   ;;  %v208_v2 = vld [vmem:[%s836_s0] sm:$0xf]  ;;  %v631_v4 = vmov 2   ;;  %v221_v6 = vlaneseq }
  0x3a   : > { %510 = vset.pattern.permute.xlu0 %v629_v0  ;;  %511 = vset.pattern.permute.xlu1 %v630_v1  ;;  %v209_v3 = vld [vmem:[%s837_s1] sm:$0xf]  ;;  %v632_v5 = vmov 3   ;;  %s443_s24 = sshll.u32 %s618_s15, 7  ;;  %s204_s19 = scalar_lea.vmem [#allocation5], %s435_s7 }
  0x3b   : > { %217 = vperm.xlu0 %510, %v208_v2   ;;  %244 = vperm.xlu1 %511, %v208_v2   ;;  %v222_v7 = vshrl.u32 %v221_v6, 7  ;;  %v207_v10 = vld [vmem:[%s182_s9] sm:$0xff]  ;;  %s343_s21 = sshll.u32 %s204_s19, 4  ;;  %s787_s28 = scalar_lea.hbm %s839_s3, %s443_s24  ;;  %s789_s21 = int_to_ptr.vmem [resolvable:$true] %s343_s21 }
  0x3c   : > { %s327_s29 = scalar_lea.sflag [#allocation4], %s765_s5  ;;  %s544_s30 = scalar_lea.vmem %s789_s21, 128 }
  0x3d   : > { %v223_v8 = vsub.s32 0, %v222_v7  ;;  %v227_v9 = vsub.s32 4, %v222_v7  ;;  %v249_v11 = vsub.s32 1, %v222_v7  ;;  %v253_v12 = vsub.s32 5, %v222_v7  ;;  %p545_p8 = scmp.ne.s32.totalorder %s789_s21, %s544_s30  ;;  %p848_p9 = scmp.ne.s32.totalorder %s843_s25, 0 }
  0x3e   : > { %v275_v13 = vsub.s32 2, %v222_v7  ;;  %v279_v14 = vsub.s32 6, %v222_v7  ;;  %v301_v21 = vsub.s32 3, %v222_v7  ;;  %v305_v22 = vsub.s32 7, %v222_v7  ;;  %s633_s15 = smov [#allocation5]  }
  0x3f   : > { %212 = vperm.xlu0 %510, %v209_v3   ;;  %512 = vset.pattern.permute.xlu1 %v631_v4  ;;  %v224_v15 = vrot.slane %v207_v10, %v223_v8  ;;  %v228_v16 = vrot.slane %v207_v10, %v227_v9  ;;  %v250_v17 = vrot.slane %v207_v10, %v249_v11  ;;  %p546_p11 = pnand %p545_p8, %p848_p9  ;;  %s548_s4 = sshll.u32 %s633_s15, 4  ;;  %s549_s4 = int_to_ptr.vmem [resolvable:$false] %s548_s4 }
  0x40   : > { %270 = vperm.xlu1 %512, %v208_v2   ;;  %v254_v18 = vrot.slane %v207_v10, %v253_v12  ;;  %v276_v19 = vrot.slane %v207_v10, %v275_v13  ;;  %v280_v20 = vrot.slane %v207_v10, %v279_v14  ;;  %v302_v31 = vrot.slane %v207_v10, %v301_v21  ;;  %s550_s7 = scalar_lea.vmem %s549_s4, 256  ;;  %p551_p7 = scmp.lt.s32.totalorder %s789_s21, %s549_s4 }
  0x41   : > { %v234_v23 = vrot.slane %v224_v15, %v223_v8  ;;  %v238_v24 = vrot.slane %v228_v16, %v223_v8  ;;  %v260_v27 = vrot.slane %v250_v17, %v249_v11  ;;  %v306_v32 = vrot.slane %v207_v10, %v305_v22  ;;  %p547_p0 = pneg %p546_p11  ;;  %p552_p13 = scmp.lt.s32.totalorder %s550_s7, %s544_s30 }
  0x42   : > { %v264_v28 = vrot.slane %v254_v18, %v249_v11  ;;  %v286_v29 = vrot.slane %v276_v19, %v275_v13  ;;  %v290_v30 = vrot.slane %v280_v20, %v275_v13  ;;  %v312_v43 = vrot.slane %v302_v31, %v301_v21 }
  0x43   : > { %513 = vset.pattern.permute.xlu0 %v632_v5  ;;  %v316_v44 = vrot.slane %v306_v32, %v301_v21  ;;  %p553_p3 = por %p552_p13, %p551_p7 }
  0x44   : > { %296 = vperm.xlu0 %513, %v208_v2  }
  0x45   : > { %p554_p6 = pnand %p553_p3, %p547_p0 }
  0xba   : > { %v218_v25 = vpop.permute.xlu0 %217  ;;  %v245_v26 = vpop.permute.xlu1 %244 }
  0xbb   : > { %v239_v33 = vmul.f32 %v234_v23, %v218_v25  ;;  %v240_v34 = vmul.f32 %v238_v24, %v218_v25  ;;  %v265_v36 = vmul.f32 %v260_v27, %v245_v26  ;;  %v266_v37 = vmul.f32 %v264_v28, %v245_v26 }
  0xbe   : > { %v213_v35 = vpop.permute.xlu0 %212 }
  0xbf   : > { %v241_v38 = vadd.f32 %v239_v33, %v213_v35  ;;  %v242_v39 = vadd.f32 %v240_v34, %v213_v35  ;;  %v271_v40 = vpop.permute.xlu1 %270 }
  0xc0   : > { %v291_v41 = vmul.f32 %v286_v29, %v271_v40  ;;  %v292_v42 = vmul.f32 %v290_v30, %v271_v40 }
  0xc1   : > { %v267_v45 = vadd.f32 %v265_v36, %v241_v38  ;;  %v268_v46 = vadd.f32 %v266_v37, %v242_v39 }
  0xc3   : > { %v293_v47 = vadd.f32 %v291_v41, %v267_v45  ;;  %v294_v48 = vadd.f32 %v292_v42, %v268_v46  ;;  %v297_v49 = vpop.permute.xlu0 %296 }
  0xc4   : > { %v317_v50 = vmul.f32 %v312_v43, %v297_v49  ;;  %v318_v51 = vmul.f32 %v316_v44, %v297_v49 }
  0xc6   : > { %v319_v52 = vadd.f32 %v317_v50, %v293_v47  ;;  %v320_v53 = vadd.f32 %v318_v51, %v294_v48 }
  0xc8   : > { %v323_v54 = vcombine.low %v319_v52, %v320_v53 }
  0xca   : > { %325 = vst [vmem:[%s204_s19] sm:$0xff] %v323_v54 }
  0xcb   : > { %557 = shalt.err (!%p554_p6)
}
  0xcc   : > { %s558_s5 = scalar_lea.hbm %s787_s28, 128  ;;  %s562_s6 = scalar_lea.hbm %s839_s3, 256 }
  0xcd   : > { %p559_p4 = scmp.ne.s32.totalorder %s787_s28, %s558_s5  ;;  %p563_p1 = scmp.lt.u32.totalorder %s787_s28, %s839_s3 }
  0xce   : > { %p564_p2 = scmp.lt.u32.totalorder %s562_s6, %s558_s5  ;;  %p566_p8 = scmp.lt.u32.totalorder %s558_s5, %s787_s28 }
  0xcf   : > { %p560_p10 = pnand %p559_p4, %p848_p9 }
  0xd0   : > { %p565_p5 = por %p564_p2, %p563_p1 }
  0xd1   : > { %p561_p12 = pneg %p560_p10 }
  0xd2   : > { %p567_p11 = por %p566_p8, %p565_p5 }
  0xd4   : > { %p568_p0 = pnand %p567_p11, %p561_p12 }
  0xd6   : > { %571 = shalt.err (!%p568_p0)
}
  0xd7   : > { %446 = dma.vmem_to_hbm [thread:$0]  (%p848_p9), %s789_s21, 128, %s787_s28, %s327_s29  }
  0xd8 PF: > { %s355_s18 = sand.u32 1, %s606_s12   ;;  %p849_p7 = scmp.ne.s32.totalorder %s844_s27, 0 }
  0xd9   : > { %p850_p13 = scmp.ge.s32.totalorder %s626_s17, 2  ;;  %s356_s24 = scalar_lea.sflag [#allocation4], %s355_s18 }
  0xdb   : > { %p453_p3 = pnand %p850_p13, %p849_p7 }
  0xdd   : > { %601 = dma.done.wait (!%p453_p3), %s356_s24, 128  }
  0xde   : > { %603 = vsyncadd (!%p453_p3), %s356_s24, 4294967168  ;;  %s19_s17 = sadd.s32 1, %s626_s17   ;;  %s851_s12 = smov %s610_s13 }
  0xdf   : > { %p16_p6 = scmp.ge.s32.totalorder %s19_s17, 4   ;;  %s852_s13 = smov %s614_s14 }
  0xe0   : > { %s853_s14 = smov %s710_s26  ;;  %s854_s15 = smov %s622_s16 }
  0xe1   : > { %s855_s16 = smov %s857_s20  ;;  %18 = sbr.rel (!%p16_p6) target bundleno = 6 (0x6), region = 77 }
  0xe8   :  { %361 = vsyncpa [#allocation3], 1 }
  0xe9   :  { %363 = vsyncpa [#allocation3 + $0x1], 1 }
  0xea   :  { %364 = vsyncpa [#allocation4], 1 }
  0xeb   :  { %366 = vsyncpa [#allocation4 + $0x1], 1 }

</bundles_post_ra>
